<compile_context>
chip_gen: v7x
topology: tpu7x:2x2x1
jax: 0.10.0
libtpu: 0.0.40
codegen_flags: <defaults>
</compile_context>

<pallas_src>
import jax
import jax.numpy as jnp
from jax import lax
from jax.experimental import pallas as pl
from jax.experimental.pallas import tpu as pltpu


def frn_kernel(x_ref, p_ref, o_ref):
    # x_ref: (TR, hw)  one (n, c) pair per row, flattened spatial on lanes
    # p_ref: (TR, 4)   fused per-row params: [|eps|, gamma, beta, tau] (f32)
    x = x_ref[...].astype(jnp.float32)

    # nu2 = mean over spatial dims (lane axis), keepdims -> (TR, 1).
    # XLU lane-reduce + EUP rsqrt sit in otherwise-idle slots (mem-bound kernel).
    nu2 = jnp.mean(x * x, axis=-1, keepdims=True)

    p = p_ref[...].astype(jnp.float32)
    eps_abs = p[:, 0:1]
    gamma = p[:, 1:2]
    beta = p[:, 2:3]
    tau = p[:, 3:4]

    inv = lax.rsqrt(nu2 + eps_abs)               # (TR, 1), broadcasts over lanes
    o_ref[...] = jnp.maximum(gamma * (x * inv) + beta, tau).astype(o_ref.dtype)


def filter_response_norm(x, eps, gamma, beta, tau, *, block_bytes=2 * 1024 * 1024):
    """x: (N, C, H, W); eps/gamma/beta/tau: (1, C, 1, 1). Returns (N, C, H, W)."""
    N, C, H, W = x.shape
    rows, hw = N * C, H * W

    x2 = x.reshape(rows, hw)

    # ---- Fused per-row parameters: (rows, 4) = [|eps|, gamma, beta, tau] ----
    def per_row(p):
        # (1, C, 1, 1) -> (rows,): replicate channel params across the batch.
        return jnp.broadcast_to(p.reshape(1, C), (N, C)).reshape(rows)

    params = jnp.stack(
        [per_row(jnp.abs(eps)), per_row(gamma), per_row(beta), per_row(tau)],
        axis=-1,
    ).astype(jnp.float32)                                      # (rows, 4)

    # ---- Row-tile size -------------------------------------------------------
    # Sublane packing multiple for the input dtype: 8 (f32) / 16 (bf16) / 32 (i8).
    itemsize = jnp.dtype(x.dtype).itemsize
    sub = 32 // itemsize
    tr = max(sub, (block_bytes // max(1, hw * itemsize)) // sub * sub)
    tr = min(tr, pl.cdiv(rows, sub) * sub)

    # Pad rows to a multiple of the tile (padded rows are masked off at the end).
    rows_p = pl.cdiv(rows, tr) * tr
    if rows_p != rows:
        pad = rows_p - rows
        x2 = jnp.pad(x2, ((0, pad), (0, 0)))
        params = jnp.pad(params, ((0, pad), (0, 0)))
        # |eps| = 1 in padded rows keeps rsqrt finite (those rows are discarded).
        params = params.at[rows:, 0].set(1.0)

    grid = (rows_p // tr,)

    # NOTE: hw (lane axis) is intentionally NOT tiled — a partial-hw block would
    # make the per-row mean wrong; full hw also keeps stores lane-dense.
    out2 = pl.pallas_call(
        frn_kernel,
        out_shape=jax.ShapeDtypeStruct((rows_p, hw), x.dtype),
        grid=grid,
        in_specs=[
            pl.BlockSpec((tr, hw), lambda i: (i, 0)),
            pl.BlockSpec((tr, 4), lambda i: (i, 0)),
        ],
        out_specs=pl.BlockSpec((tr, hw), lambda i: (i, 0)),
        compiler_params=pltpu.CompilerParams(
            dimension_semantics=("parallel",),   # rows are independent -> megacore
        ),
    )(x2, params)

    return out2[:rows].reshape(N, C, H, W)


def _reference(x, eps, gamma, beta, tau):
    nu2 = jnp.mean(x * x, axis=(2, 3), keepdims=True)
    xn = x * lax.rsqrt(nu2 + jnp.abs(eps))
    return jnp.maximum(gamma * xn + beta, tau)


def _make_params(C, eps_val):
    # Deterministic parameter init mirroring reset_parameters():
    #   gamma = ones, beta = zeros, tau = zeros, eps = ones * eps_val
    shape = (1, C, 1, 1)
    eps = jnp.ones(shape, jnp.float32) * eps_val
    gamma = jnp.ones(shape, jnp.float32)
    beta = jnp.zeros(shape, jnp.float32)
    tau = jnp.zeros(shape, jnp.float32)
    return eps, gamma, beta, tau


if __name__ == "__main__":
    key = jax.random.PRNGKey(0)

    # ---- Case 1: module config (ndim=4, num_features=4, eps=1e-6) -----------
    N, C, H, W = 2, 4, 16, 16
    k1, k2 = jax.random.split(key)
    x = jax.random.normal(k1, (N, C, H, W), dtype=jnp.float32)
    eps, gamma, beta, tau = _make_params(C, 1e-6)

    out = jax.block_until_ready(filter_response_norm(x, eps, gamma, beta, tau))
    ref = _reference(x, eps, gamma, beta, tau)
    assert out.shape == (N, C, H, W)
    assert jnp.allclose(out, ref, atol=1e-5, rtol=1e-5)

    # ---- Case 2: exercise multi-step grid + row padding (rows=15, tr=8) ------
    N2, C2, H2, W2 = 3, 5, 16, 16
    x2 = jax.random.normal(k2, (N2, C2, H2, W2), dtype=jnp.float32)
    eps2, gamma2, beta2, tau2 = _make_params(C2, 1e-6)
    # Non-trivial affine/threshold params so the clamp path is tested.
    gamma2 = gamma2 * 1.5
    beta2 = beta2 + 0.1
    tau2 = tau2 + 0.05

    out2 = jax.block_until_ready(
        filter_response_norm(
            x2, eps2, gamma2, beta2, tau2,
            block_bytes=H2 * W2 * 4 * 8,  # force tr=8 -> grid=(2,), padded rows
        )
    )
    ref2 = _reference(x2, eps2, gamma2, beta2, tau2)
    assert out2.shape == (N2, C2, H2, W2)
    assert jnp.allclose(out2, ref2, atol=1e-5, rtol=1e-5)

    print("KERNEL_OK")
</pallas_src>

<mosaic_0001>
module attributes {stable_mosaic.version = 11 : i64} {
  func.func @frn_kernel(%arg0: i32, %arg1: memref<8x256xf32, #tpu.memory_space<vmem>>, %arg2: memref<8x4xf32, #tpu.memory_space<vmem>>, %arg3: memref<8x256xf32, #tpu.memory_space<vmem>>) attributes {dimension_semantics = [#tpu.dimension_semantics<parallel>], iteration_bounds = array<i64: 1>, scalar_prefetch = 0 : i64, scratch_operands = 0 : i64, tpu.core_type = #tpu.core_type<tc>, window_params = [{transform_indices = @transform_0, window_bounds = array<i64: 8, 256>}, {transform_indices = @transform_1, window_bounds = array<i64: 8, 4>}, {transform_indices = @transform_2, window_bounds = array<i64: 8, 256>}]} {
    %c0 = arith.constant 0 : index
    %c0_0 = arith.constant 0 : index
    %0 = vector.load %arg1[%c0, %c0_0] : memref<8x256xf32, #tpu.memory_space<vmem>>, vector<8x256xf32>
    %1 = arith.mulf %0, %0 : vector<8x256xf32>
    %cst = arith.constant dense<0.000000e+00> : vector<8xf32>
    %2 = vector.multi_reduction <add>, %1, %cst [1] : vector<8x256xf32> to vector<8xf32>
    %3 = vector.shape_cast %2 : vector<8xf32> to vector<8x1xf32>
    %cst_1 = arith.constant 2.560000e+02 : f32
    %4 = vector.broadcast %cst_1 : f32 to vector<8x1xf32>
    %5 = arith.divf %3, %4 : vector<8x1xf32>
    %c0_2 = arith.constant 0 : index
    %c0_3 = arith.constant 0 : index
    %6 = vector.load %arg2[%c0_2, %c0_3] : memref<8x4xf32, #tpu.memory_space<vmem>>, vector<8x4xf32>
    %7 = vector.extract_strided_slice %6 {offsets = [0, 0], sizes = [8, 1], strides = [1, 1]} : vector<8x4xf32> to vector<8x1xf32>
    %8 = vector.extract_strided_slice %6 {offsets = [0, 1], sizes = [8, 1], strides = [1, 1]} : vector<8x4xf32> to vector<8x1xf32>
    %9 = vector.extract_strided_slice %6 {offsets = [0, 2], sizes = [8, 1], strides = [1, 1]} : vector<8x4xf32> to vector<8x1xf32>
    %10 = vector.extract_strided_slice %6 {offsets = [0, 3], sizes = [8, 1], strides = [1, 1]} : vector<8x4xf32> to vector<8x1xf32>
    %11 = arith.addf %5, %7 : vector<8x1xf32>
    %12 = math.rsqrt %11 : vector<8x1xf32>
    %13 = vector.broadcast %12 : vector<8x1xf32> to vector<8x256xf32>
    %14 = arith.mulf %0, %13 : vector<8x256xf32>
    %15 = vector.broadcast %8 : vector<8x1xf32> to vector<8x256xf32>
    %16 = arith.mulf %15, %14 : vector<8x256xf32>
    %17 = vector.broadcast %9 : vector<8x1xf32> to vector<8x256xf32>
    %18 = arith.addf %16, %17 : vector<8x256xf32>
    %19 = vector.broadcast %10 : vector<8x1xf32> to vector<8x256xf32>
    %20 = arith.maximumf %18, %19 : vector<8x256xf32>
    %c0_4 = arith.constant 0 : index
    %c0_5 = arith.constant 0 : index
    %21 = vector.load %arg3[%c0_4, %c0_5] : memref<8x256xf32, #tpu.memory_space<vmem>>, vector<8x256xf32>
    tpu.vector_store %arg3[%c0_4, %c0_5], %20 {strides = array<i32>} : memref<8x256xf32, #tpu.memory_space<vmem>>, vector<8x256xf32>,
    return
  }
  func.func @transform_0(%arg0: i32) -> (i32, i32) {
    %c0_i32 = arith.constant 0 : i32
    %c0_i32_0 = arith.constant 0 : i32
    return %arg0, %c0_i32 : i32, i32
  }
  func.func @transform_1(%arg0: i32) -> (i32, i32) {
    %c0_i32 = arith.constant 0 : i32
    %c0_i32_0 = arith.constant 0 : i32
    return %arg0, %c0_i32 : i32, i32
  }
  func.func @transform_2(%arg0: i32) -> (i32, i32) {
    %c0_i32 = arith.constant 0 : i32
    %c0_i32_0 = arith.constant 0 : i32
    return %arg0, %c0_i32 : i32, i32
  }
}

</mosaic_0001>

<bundles_post_ra>
// kernel: tpu_custom_call.1
= control target key start
LH: loop header
LB: loop body
LE: loop exit
PB: predicated region body
PF: predicated region fallthrough
CT: control target
= control target key end

     0   :  { %7 = vsyncpa [#allocation3], 0  ;;  %s188_s0 = inlined_call_operand.hbm [shape: f32[8,256], index: 0, kind: input, shape index: {}]   ;;  %s189_s1 = inlined_call_operand.vmem [shape: f32[8,4], index: 1, kind: input, shape index: {}]   ;;  %s190_s2 = inlined_call_operand.hbm [shape: f32[8,256], index: 2, kind: output, shape index: {}]  }
   0x1   :  { %8 = vsyncpa [#allocation4], 0  ;;  %s140_s9 = smov [#allocation2]   ;;  %s92_s13 = scalar_lea.hbm %s188_s0, 256 }
   0x2   :  { %s15_s10 = sshll.u32 %s140_s9, 4  ;;  %p93_p0 = scmp.ne.s32.totalorder %s188_s0, %s92_s13  ;;  %s16_s10 = int_to_ptr.vmem [resolvable:$true] %s15_s10 }
   0x3   :  { %p96_p1 = scmp.lt.u32.totalorder %s92_s13, %s188_s0 }
   0x5   :  { %p98_p2 = pnand %p96_p1, %p93_p0 }
   0x7   :  { %101 = shalt.err (!%p98_p2)
}
   0x8   :  { %s102_s18 = scalar_lea.vmem %s16_s10, 256  ;;  %p107_p4 = scmp.lt.s32.totalorder %s16_s10, %s16_s10 }
   0x9   :  { %p103_p3 = scmp.ne.s32.totalorder %s16_s10, %s102_s18  ;;  %p108_p5 = scmp.lt.s32.totalorder %s102_s18, %s102_s18 }
   0xb   :  { %p109_p6 = por %p108_p5, %p107_p4 }
   0xd   :  { %p110_p7 = pnand %p109_p6, %p103_p3 }
   0xf   :  { %113 = shalt.err (!%p110_p7)
}
  0x10   :  { %18 = dma.hbm_to_vmem [thread:$0]  %s188_s0, 256, %s16_s10, [#allocation3]  }
  0x11   :  { %136 = dma.done.wait [#allocation3], 256  }
  0x12   :  { %137 = vsyncadd [#allocation3], 4294967040  ;;  %v24_v0 = vld [vmem:[#allocation2] sm:$0xff]  ;;  %v25_v1 = vld [vmem:[#allocation2 + $0x8] sm:$0xff]  ;;  %v141_v6 = vmov 1   ;;  %v142_v7 = vmov 0  }
  0x13   :  { %v26_v2 = vmul.f32 %v24_v0, %v24_v0  ;;  %v27_v3 = vmul.f32 %v25_v1, %v25_v1  ;;  %v33_v5 = vld [vmem:[%s189_s1] sm:$0xff]  ;;  %86 = vset.pattern.permute.xlu1 %v141_v6  ;;  %85 = vset.pattern.permute.xlu0 %v142_v7  ;;  %v143_v8 = vmov 2   ;;  %v144_v9 = vmov 3   ;;  %s145_s0 = smov [#allocation5]  }
  0x14   :  { %45 = vperm.xlu1 %86, %v33_v5   ;;  %s70_s1 = sshll.u32 %s145_s0, 4  ;;  %s71_s1 = int_to_ptr.vmem [resolvable:$true] %s70_s1 }
  0x15   :  { %v28_v4 = vadd.f32 %v27_v3, %v26_v2  ;;  %s114_s23 = scalar_lea.vmem %s71_s1, 256  ;;  %p119_p9 = scmp.lt.s32.totalorder %s71_s1, %s71_s1 }
  0x16   :  { %p115_p8 = scmp.ne.s32.totalorder %s71_s1, %s114_s23  ;;  %p120_p10 = scmp.lt.s32.totalorder %s114_s23, %s114_s23 }
  0x17   :  { %29 = vadd.xlane.f32.xlu0 %v28_v4 }
  0x18   :  { %87 = vset.pattern.permute.xlu1 %v143_v8  ;;  %p121_p11 = por %p120_p10, %p119_p9 }
  0x19   :  { %51 = vperm.xlu1 %87, %v33_v5  }
  0x1a   :  { %p122_p12 = pnand %p121_p11, %p115_p8 }
  0x1d   :  { %88 = vset.pattern.permute.xlu1 %v144_v9 }
  0x1e   :  { %57 = vperm.xlu1 %88, %v33_v5  }
  0x93   :  { %v46_v14 = vpop.permute.xlu1 %45 }
  0x98   :  { %v52_v15 = vpop.permute.xlu1 %51 }
  0x9d   :  { %v58_v21 = vpop.permute.xlu1 %57 }
  0xa4   :  { %v30_v10 = vpop.xlane.xlu0 %29 }
  0xa5   :  { %v32_v11 = vmul.f32 0.00390625, %v30_v10 }
  0xa7   :  { %v34_v12 = vadd.f32 %v33_v5, %v32_v11 }
  0xa9   :  { %90 = vrsqrt.f32 %v34_v12 }
  0xb3   :  { %v91_v13 = vpop.eup %90 }
  0xb4   :  { %38 = vperm.xlu0 %85, %v91_v13  }
  0xb8   :  { %89 = vset.pattern.permute.xlu0 %v144_v9 }
 0x133   :  { %v39_v16 = vpop.permute.xlu0 %38 }
 0x134   :  { %v41_v17 = vmul.f32 %v39_v16, %v24_v0  ;;  %v42_v18 = vmul.f32 %v39_v16, %v25_v1 }
 0x136   :  { %v48_v19 = vmul.f32 %v46_v14, %v41_v17  ;;  %v49_v20 = vmul.f32 %v46_v14, %v42_v18 }
 0x138   :  { %v54_v22 = vadd.f32 %v52_v15, %v48_v19  ;;  %v55_v23 = vadd.f32 %v52_v15, %v49_v20 }
 0x13a   :  { %v60_v24 = vmax.f32 %v54_v22, %v58_v21  ;;  %v61_v25 = vmax.f32 %v55_v23, %v58_v21 }
 0x13c   :  { %62 = vst [vmem:[#allocation5] sm:$0xff] %v60_v24  ;;  %63 = vst [vmem:[#allocation5 + $0x8] sm:$0xff] %v61_v25 }
 0x13d   :  { %125 = shalt.err (!%p122_p12)
}
 0x13e   :  { %s126_s26 = scalar_lea.hbm %s190_s2, 256 }
 0x13f   :  { %p127_p13 = scmp.ne.s32.totalorder %s190_s2, %s126_s26  ;;  %p130_p0 = scmp.lt.u32.totalorder %s126_s26, %s190_s2 }
 0x141   :  { %p132_p1 = pnand %p130_p0, %p127_p13 }
 0x143   :  { %135 = shalt.err (!%p132_p1)
}
 0x144   :  { %73 = dma.vmem_to_hbm [thread:$0]  %s71_s1, 256, %s190_s2, [#allocation4]  }
 0x145   :  { %138 = dma.done.wait [#allocation4], 256  }
 0x146   :  { %139 = vsyncadd [#allocation4], 4294967040 }
 0x147   :  { %77 = vsyncpa [#allocation3], 1 }
 0x148   :  { %78 = vsyncpa [#allocation4], 1 }

</bundles_post_ra>
